<compile_context>
chip_gen: v5e
topology: v5e:2x2
jax: 0.10.0
libtpu: 0.0.40
codegen_flags: <defaults>
</compile_context>

<pallas_src>
import functools
import math

import jax
import jax.numpy as jnp
from jax.experimental import pallas as pl
from jax.experimental.pallas import tpu as pltpu


def _round_up(x, m):
    return (x + m - 1) // m * m


# ----------------------------------------------------------------------------
# Fused DownBlock kernel: one program per bk batch elements, everything in vregs
# ----------------------------------------------------------------------------
def _down_block_kernel(xim_ref, wd_ref, bd_ref, wsc_ref, bsc_ref,
                       w1_ref, b1_ref, w2_ref, b2_ref, o_ref,
                       *, eps, bk, seq, n_ch, c_pad, packed):
    f32 = jnp.float32
    mm = jnp.bfloat16
    M = bk * seq

    # down: Conv1d(k=4, s=4) == one matmul on the (M, 4*C_in) im2col'd bf16 input.
    x2 = xim_ref[...].reshape(M, -1)                                    # bf16
    h = jnp.dot(x2, wd_ref[...], preferred_element_type=f32) + bd_ref[...]   # (M, C_pad) f32

    # Edge masks for the k=3/pad=1 convs: built once, reused by both conv3 calls.
    pos = jax.lax.broadcasted_iota(jnp.int32, (M, 1), 0) % seq
    first = pos == 0
    last = pos == seq - 1

    def norm_silu(v):
        # InstanceNorm1d: per-(instance, channel) stats over length, one pass
        # (mean + mean-of-squares), biased variance, eps inside rsqrt.
        v3 = v.reshape(bk, seq, c_pad)
        m = jnp.mean(v3, axis=1, keepdims=True)
        ms = jnp.mean(v3 * v3, axis=1, keepdims=True)
        var = jnp.maximum(ms - m * m, 0.0)
        v3 = (v3 - m) * jax.lax.rsqrt(var + eps)
        v = v3.reshape(M, c_pad)
        # SiLU via tanh: single EUP op per element, no overflow for large |v|.
        return v * (0.5 * jnp.tanh(0.5 * v) + 0.5)

    def conv3(v, w_ref, b_ref):
        # k=3 / pad=1 conv.  Neighbouring rows come from XLU sublane rolls; rows that would
        # cross an instance boundary (including across bk-packed batch elements) are masked.
        prev = jnp.where(first, 0.0, pltpu.roll(v, 1, axis=0))          # v[l-1]
        nxt = jnp.where(last, 0.0, pltpu.roll(v, M - 1, axis=0))        # v[l+1]
        if packed:
            # 3*n_ch <= 128: pack the three taps into ONE 128-lane K tile with lane rolls.
            # Padding lanes are exact zeros, so the rotation wrap-around contributes nothing.
            cols = prev + pltpu.roll(v, n_ch, axis=1) + pltpu.roll(nxt, 2 * n_ch, axis=1)
            y = jnp.dot(cols.astype(mm), w_ref[...], preferred_element_type=f32)
        else:
            # Three accumulating matmuls; no (M, 3*C_pad) cols buffer is materialized.
            y = jnp.dot(prev.astype(mm), w_ref[pl.ds(0, c_pad), :],
                        preferred_element_type=f32)
            y = y + jnp.dot(v.astype(mm), w_ref[pl.ds(c_pad, c_pad), :],
                            preferred_element_type=f32)
            y = y + jnp.dot(nxt.astype(mm), w_ref[pl.ds(2 * c_pad, c_pad), :],
                            preferred_element_type=f32)
        return y + b_ref[...]

    # shortcut and conv1 see the identical norm->SiLU of h (InstanceNorm has no params),
    # so compute it once and reuse.
    hn = norm_silu(h)                                                    # (M, C_pad) f32
    res = jnp.dot(hn.astype(mm), wsc_ref[...],
                  preferred_element_type=f32) + bsc_ref[...]             # shortcut, (M, C_out)
    t = conv3(hn, w1_ref, b1_ref)                                        # conv1, (M, C_pad)
    t = conv3(norm_silu(t), w2_ref, b2_ref)                              # conv2, (M, C_out)
    o_ref[...] = (res + t).reshape(bk, seq, n_ch).astype(o_ref.dtype)    # fused residual add


def _pick_bk(batch, seq):
    """Batch elements per grid step: target ~512 MXU rows, keep >=2 grid steps if possible."""
    if seq % 8 != 0:
        return 1                       # keep (bk,L,C) <-> (bk*L,C) reshapes layout-free
    bk = max(1, min(batch, 512 // max(seq, 1)))
    if batch >= 2:
        bk = min(bk, batch // 2)       # >=2 "parallel" steps so both v7x TCs get work
    bk = max(bk, 1)
    while batch % bk:
        bk -= 1
    return bk


def down_block(x_ncl, params, *, eps=1e-5):
    """DownBlock forward.  x_ncl: (B, C_in, L_in) in the PyTorch NCL layout."""
    B, C_in, L_in = x_ncl.shape
    wd, bd = params["down"]["w"], params["down"]["b"]                    # (C_out, C_in, 4)
    C_out = wd.shape[0]
    assert wd.shape == (C_out, C_in, 4) and L_in % 4 == 0
    L = L_in // 4
    C_pad = _round_up(C_out, 128)      # v5e MXU tile; on v6e/v7x a 256 pad fills both MXUs
    pc = C_pad - C_out
    packed = 3 * C_out <= 128          # pack the 3 conv taps into one 128-lane K tile
    bk = _pick_bk(B, L)
    mm = jnp.bfloat16

    # Glue: NCL -> channels-last, then the non-overlapping k4/s4 im2col (free reshape of
    # contiguous channels-last data; column index = k*C_in + ci).  Pre-cast to bf16.
    xim = jnp.transpose(x_ncl, (0, 2, 1)).reshape(B, L, 4 * C_in).astype(mm)

    # Weights -> bf16 matmul layout; biases stay f32.
    wd2 = jnp.pad(jnp.transpose(wd, (2, 1, 0)).reshape(4 * C_in, C_out),
                  ((0, 0), (0, pc))).astype(mm)                          # (4*C_in, C_pad)
    bd2 = jnp.pad(bd, (0, pc)).reshape(1, C_pad).astype(jnp.float32)

    def pack_k3(p, n_out):
        w, b = p["w"], p["b"]                                            # (C_out, C_out, 3)
        if packed:
            wt = jnp.transpose(w, (2, 1, 0)).reshape(3 * C_out, C_out)   # row = k*C_out + ci
            wt = jnp.pad(wt, ((0, 128 - 3 * C_out), (0, n_out - C_out)))
        else:
            wp = jnp.pad(w, ((0, n_out - C_out), (0, pc), (0, 0)))
            wt = jnp.transpose(wp, (2, 1, 0)).reshape(3 * C_pad, n_out)  # row = k*C_pad + ci
        bt = jnp.pad(b, (0, n_out - C_out)).reshape(1, n_out).astype(jnp.float32)
        return wt.astype(mm), bt

    w1, b1 = pack_k3(params["conv1"], C_pad)      # conv1 feeds conv2 -> keep padded lanes
    w2, b2 = pack_k3(params["conv2"], C_out)      # conv2 feeds the (un-padded) output
    wsc = jnp.pad(params["shortcut"]["w"][:, :, 0].T, ((0, pc), (0, 0))).astype(mm)
    bsc = params["shortcut"]["b"].reshape(1, C_out).astype(jnp.float32)

    # Scoped-VMEM limit sized from the actual per-step footprint (capped for v7x's 64 MiB).
    nbytes = lambda a: int(a.size) * a.dtype.itemsize
    weight_bytes = sum(nbytes(a) for a in (wd2, bd2, wsc, bsc, w1, b1, w2, b2))
    io_bytes = 2 * bk * L * (4 * C_in * 2 + C_out * x_ncl.dtype.itemsize)   # double-buffered
    act_bytes = 12 * bk * L * C_pad * 4                                     # f32 live set
    vmem_limit = int(min(64 << 20, max(16 << 20, 4 * (weight_bytes + io_bytes + act_bytes))))

    def full(shape):
        return pl.BlockSpec(shape, lambda b: (0,) * len(shape))

    kernel = functools.partial(_down_block_kernel, eps=eps, bk=bk, seq=L,
                               n_ch=C_out, c_pad=C_pad, packed=packed)

    out = pl.pallas_call(
        kernel,
        out_shape=jax.ShapeDtypeStruct((B, L, C_out), x_ncl.dtype),
        grid_spec=pltpu.PrefetchScalarGridSpec(
            num_scalar_prefetch=0,
            grid=(B // bk,),
            in_specs=[
                pl.BlockSpec((bk, L, 4 * C_in), lambda b: (b, 0, 0)),
                full(wd2.shape), full(bd2.shape),
                full(wsc.shape), full(bsc.shape),
                full(w1.shape), full(b1.shape),
                full(w2.shape), full(b2.shape),
            ],
            out_specs=pl.BlockSpec((bk, L, C_out), lambda b: (b, 0, 0)),
        ),
        compiler_params=pltpu.CompilerParams(
            dimension_semantics=("parallel",),
            vmem_limit_bytes=vmem_limit),
    )(xim, wd2, bd2, wsc, bsc, w1, b1, w2, b2)

    # Glue: back to NCL (B, C_out, L_in // 4); no channel un-padding needed.
    return jnp.transpose(out, (0, 2, 1))


# ----------------------------------------------------------------------------
# Pure-JAX reference (mirrors the PyTorch module) + parameter init
# ----------------------------------------------------------------------------
def _conv1d_ref(x, w, b, *, stride, padding):
    y = jax.lax.conv_general_dilated(
        x, w, window_strides=(stride,), padding=[(padding, padding)],
        dimension_numbers=("NCH", "OIH", "NCH"))
    return y + b[None, :, None]


def _conv_layer_ref(x, p, *, stride, padding, eps=1e-5):
    m = jnp.mean(x, axis=-1, keepdims=True)
    v = jnp.mean(jnp.square(x - m), axis=-1, keepdims=True)
    x = (x - m) * jax.lax.rsqrt(v + eps)
    x = x * jax.nn.sigmoid(x)
    return _conv1d_ref(x, p["w"], p["b"], stride=stride, padding=padding)


def down_block_ref(x, params):
    x = _conv1d_ref(x, params["down"]["w"], params["down"]["b"], stride=4, padding=0)
    res = _conv_layer_ref(x, params["shortcut"], stride=1, padding=0)
    t = _conv_layer_ref(x, params["conv1"], stride=1, padding=1)
    t = _conv_layer_ref(t, params["conv2"], stride=1, padding=1)
    return res + t


def _conv_params(key, c_in, c_out, k):
    kw, kb = jax.random.split(key)
    scale = 1.0 / math.sqrt(c_in * k)
    return {"w": jax.random.normal(kw, (c_out, c_in, k), jnp.float32) * scale,
            "b": jax.random.normal(kb, (c_out,), jnp.float32) * 0.01}


def init_down_block_params(key, in_channels, out_channels):
    k = jax.random.split(key, 4)
    return {
        "down": _conv_params(k[0], in_channels, out_channels, 4),
        "conv1": _conv_params(k[1], out_channels, out_channels, 3),
        "conv2": _conv_params(k[2], out_channels, out_channels, 3),
        "shortcut": _conv_params(k[3], out_channels, out_channels, 1),
    }


if __name__ == "__main__":
    B, C_IN, C_OUT, L_IN = 2, 8, 16, 64

    key = jax.random.PRNGKey(0)
    kx, kp = jax.random.split(key)
    x = jax.random.normal(kx, (B, C_IN, L_IN), jnp.float32)
    params = init_down_block_params(kp, C_IN, C_OUT)

    out = jax.jit(lambda xx: down_block(xx, params))(x)
    out = jax.block_until_ready(out)

    assert out.shape == (B, C_OUT, L_IN // 4), out.shape
    assert bool(jnp.all(jnp.isfinite(out)))

    # Check against a pure-JAX f32 reference (kernel matmuls use bf16 operands -> loose tol).
    ref = down_block_ref(x, params)
    err = float(jnp.max(jnp.abs(out - ref)))
    assert err < 1e-1, f"max abs err vs reference: {err}"

    print("KERNEL_OK")
</pallas_src>

<mosaic_0001>
module attributes {stable_mosaic.version = 11 : i64} {
  func.func @_down_block_kernel(%arg0: i32, %arg1: memref<1x16x32xbf16, #tpu.memory_space<vmem>>, %arg2: memref<32x128xbf16, #tpu.memory_space<vmem>>, %arg3: memref<1x128xf32, #tpu.memory_space<vmem>>, %arg4: memref<128x16xbf16, #tpu.memory_space<vmem>>, %arg5: memref<1x16xf32, #tpu.memory_space<vmem>>, %arg6: memref<128x128xbf16, #tpu.memory_space<vmem>>, %arg7: memref<1x128xf32, #tpu.memory_space<vmem>>, %arg8: memref<128x16xbf16, #tpu.memory_space<vmem>>, %arg9: memref<1x16xf32, #tpu.memory_space<vmem>>, %arg10: memref<1x16x16xf32, #tpu.memory_space<vmem>>) attributes {dimension_semantics = [#tpu.dimension_semantics<parallel>], iteration_bounds = array<i64: 2>, scalar_prefetch = 0 : i64, scratch_operands = 0 : i64, tpu.core_type = #tpu.core_type<tc>, window_params = [{transform_indices = @transform_0, window_bounds = array<i64: 1, 16, 32>}, {pipeline_mode = #tpu.pipeline_mode<synchronous>, transform_indices = @transform_1, window_bounds = array<i64: 32, 128>}, {pipeline_mode = #tpu.pipeline_mode<synchronous>, transform_indices = @transform_2, window_bounds = array<i64: 1, 128>}, {pipeline_mode = #tpu.pipeline_mode<synchronous>, transform_indices = @transform_3, window_bounds = array<i64: 128, 16>}, {pipeline_mode = #tpu.pipeline_mode<synchronous>, transform_indices = @transform_4, window_bounds = array<i64: 1, 16>}, {pipeline_mode = #tpu.pipeline_mode<synchronous>, transform_indices = @transform_5, window_bounds = array<i64: 128, 128>}, {pipeline_mode = #tpu.pipeline_mode<synchronous>, transform_indices = @transform_6, window_bounds = array<i64: 1, 128>}, {pipeline_mode = #tpu.pipeline_mode<synchronous>, transform_indices = @transform_7, window_bounds = array<i64: 128, 16>}, {pipeline_mode = #tpu.pipeline_mode<synchronous>, transform_indices = @transform_8, window_bounds = array<i64: 1, 16>}, {transform_indices = @transform_9, window_bounds = array<i64: 1, 16, 16>}]} {
    %c0 = arith.constant 0 : index
    %c0_0 = arith.constant 0 : index
    %c0_1 = arith.constant 0 : index
    %0 = vector.load %arg1[%c0, %c0_0, %c0_1] : memref<1x16x32xbf16, #tpu.memory_space<vmem>>, vector<1x16x32xbf16>
    %1 = vector.shape_cast %0 : vector<1x16x32xbf16> to vector<16x32xbf16>
    %c0_2 = arith.constant 0 : index
    %c0_3 = arith.constant 0 : index
    %2 = vector.load %arg2[%c0_2, %c0_3] : memref<32x128xbf16, #tpu.memory_space<vmem>>, vector<32x128xbf16>
    %cst = arith.constant dense<0.000000e+00> : vector<16x128xf32>
    %3 = tpu.matmul %1, %2, %cst {dimension_numbers = #tpu.dot_dimension_numbers<[1], [0], [0], [1], [0, 0, 1, 1], [], []>} : vector<16x32xbf16>, vector<32x128xbf16>, vector<16x128xf32> -> vector<16x128xf32>
    %c0_4 = arith.constant 0 : index
    %c0_5 = arith.constant 0 : index
    %4 = vector.load %arg3[%c0_4, %c0_5] : memref<1x128xf32, #tpu.memory_space<vmem>>, vector<1x128xf32>
    %5 = vector.broadcast %4 : vector<1x128xf32> to vector<16x128xf32>
    %6 = arith.addf %3, %5 : vector<16x128xf32>
    %7 = tpu.iota {dimensions = array<i32: 0>} : vector<16x1xi32>
    %c16_i32 = arith.constant 16 : i32
    %c0_i32 = arith.constant 0 : i32
    %8 = arith.cmpi eq, %c16_i32, %c0_i32 : i32
    %c1_i32 = arith.constant 1 : i32
    %9 = arith.select %8, %c1_i32, %c16_i32 : i32
    %10 = vector.broadcast %9 : i32 to vector<16x1xi32>
    %11 = arith.remsi %7, %10 : vector<16x1xi32>
    %c0_i32_6 = arith.constant 0 : i32
    %12 = vector.broadcast %c0_i32_6 : i32 to vector<16x1xi32>
    %13 = arith.cmpi ne, %11, %12 : vector<16x1xi32>
    %c0_i32_7 = arith.constant 0 : i32
    %14 = vector.broadcast %c0_i32_7 : i32 to vector<16x1xi32>
    %15 = arith.cmpi slt, %11, %14 : vector<16x1xi32>
    %c0_i32_8 = arith.constant 0 : i32
    %16 = arith.cmpi slt, %9, %c0_i32_8 : i32
    %17 = vector.broadcast %16 : i1 to vector<16x1xi1>
    %18 = vector.broadcast %17 : vector<16x1xi1> to vector<16x1xi1>
    %19 = arith.xori %15, %18 : vector<16x1xi1>
    %20 = arith.andi %19, %13 : vector<16x1xi1>
    %21 = vector.broadcast %9 : i32 to vector<16x1xi32>
    %22 = arith.addi %11, %21 : vector<16x1xi32>
    %23 = arith.select %20, %22, %11 : vector<16x1xi1>, vector<16x1xi32>
    %c0_i32_9 = arith.constant 0 : i32
    %24 = vector.broadcast %c0_i32_9 : i32 to vector<16x1xi32>
    %25 = arith.cmpi eq, %23, %24 : vector<16x1xi32>
    %c15_i32 = arith.constant 15 : i32
    %26 = vector.broadcast %c15_i32 : i32 to vector<16x1xi32>
    %27 = arith.cmpi eq, %23, %26 : vector<16x1xi32>
    %28 = vector.shape_cast %6 : vector<16x128xf32> to vector<1x16x128xf32>
    %cst_10 = arith.constant dense<0.000000e+00> : vector<1x128xf32>
    %29 = vector.multi_reduction <add>, %28, %cst_10 [1] : vector<1x16x128xf32> to vector<1x128xf32>
    %30 = vector.shape_cast %29 : vector<1x128xf32> to vector<1x1x128xf32>
    %cst_11 = arith.constant 1.600000e+01 : f32
    %31 = vector.broadcast %cst_11 : f32 to vector<1x1x128xf32>
    %32 = arith.divf %30, %31 : vector<1x1x128xf32>
    %33 = arith.mulf %28, %28 : vector<1x16x128xf32>
    %cst_12 = arith.constant dense<0.000000e+00> : vector<1x128xf32>
    %34 = vector.multi_reduction <add>, %33, %cst_12 [1] : vector<1x16x128xf32> to vector<1x128xf32>
    %35 = vector.shape_cast %34 : vector<1x128xf32> to vector<1x1x128xf32>
    %cst_13 = arith.constant 1.600000e+01 : f32
    %36 = vector.broadcast %cst_13 : f32 to vector<1x1x128xf32>
    %37 = arith.divf %35, %36 : vector<1x1x128xf32>
    %38 = arith.mulf %32, %32 : vector<1x1x128xf32>
    %39 = arith.subf %37, %38 : vector<1x1x128xf32>
    %cst_14 = arith.constant 0.000000e+00 : f32
    %40 = vector.broadcast %cst_14 : f32 to vector<1x1x128xf32>
    %41 = arith.maximumf %39, %40 : vector<1x1x128xf32>
    %42 = vector.broadcast %32 : vector<1x1x128xf32> to vector<1x16x128xf32>
    %43 = arith.subf %28, %42 : vector<1x16x128xf32>
    %cst_15 = arith.constant 9.99999974E-6 : f32
    %44 = vector.broadcast %cst_15 : f32 to vector<1x1x128xf32>
    %45 = arith.addf %41, %44 : vector<1x1x128xf32>
    %46 = math.rsqrt %45 : vector<1x1x128xf32>
    %47 = vector.broadcast %46 : vector<1x1x128xf32> to vector<1x16x128xf32>
    %48 = arith.mulf %43, %47 : vector<1x16x128xf32>
    %49 = vector.shape_cast %48 : vector<1x16x128xf32> to vector<16x128xf32>
    %cst_16 = arith.constant 5.000000e-01 : f32
    %50 = vector.broadcast %cst_16 : f32 to vector<16x128xf32>
    %51 = arith.mulf %50, %49 : vector<16x128xf32>
    %52 = math.tanh %51 : vector<16x128xf32>
    %cst_17 = arith.constant 5.000000e-01 : f32
    %53 = vector.broadcast %cst_17 : f32 to vector<16x128xf32>
    %54 = arith.mulf %53, %52 : vector<16x128xf32>
    %cst_18 = arith.constant 5.000000e-01 : f32
    %55 = vector.broadcast %cst_18 : f32 to vector<16x128xf32>
    %56 = arith.addf %54, %55 : vector<16x128xf32>
    %57 = arith.mulf %49, %56 : vector<16x128xf32>
    %58 = arith.truncf %57 : vector<16x128xf32> to vector<16x128xbf16>
    %c0_19 = arith.constant 0 : index
    %c0_20 = arith.constant 0 : index
    %59 = vector.load %arg4[%c0_19, %c0_20] : memref<128x16xbf16, #tpu.memory_space<vmem>>, vector<128x16xbf16>
    %cst_21 = arith.constant dense<0.000000e+00> : vector<16x16xf32>
    %60 = tpu.matmul %58, %59, %cst_21 {dimension_numbers = #tpu.dot_dimension_numbers<[1], [0], [0], [1], [0, 0, 1, 1], [], []>} : vector<16x128xbf16>, vector<128x16xbf16>, vector<16x16xf32> -> vector<16x16xf32>
    %c0_22 = arith.constant 0 : index
    %c0_23 = arith.constant 0 : index
    %61 = vector.load %arg5[%c0_22, %c0_23] : memref<1x16xf32, #tpu.memory_space<vmem>>, vector<1x16xf32>
    %62 = vector.broadcast %61 : vector<1x16xf32> to vector<16x16xf32>
    %63 = arith.addf %60, %62 : vector<16x16xf32>
    %c1_i32_24 = arith.constant 1 : i32
    %64 = tpu.dynamic_rotate %57 by %c1_i32_24 dim 0 : vector<16x128xf32>, i32 -> vector<16x128xf32>
    %cst_25 = arith.constant 0.000000e+00 : f32
    %65 = vector.shape_cast %25 : vector<16x1xi1> to vector<16x1xi1>
    %66 = vector.broadcast %65 : vector<16x1xi1> to vector<16x128xi1>
    %67 = vector.broadcast %cst_25 : f32 to vector<16x128xf32>
    %68 = arith.select %66, %67, %64 : vector<16x128xi1>, vector<16x128xf32>
    %c15_i32_26 = arith.constant 15 : i32
    %69 = tpu.dynamic_rotate %57 by %c15_i32_26 dim 0 : vector<16x128xf32>, i32 -> vector<16x128xf32>
    %cst_27 = arith.constant 0.000000e+00 : f32
    %70 = vector.shape_cast %27 : vector<16x1xi1> to vector<16x1xi1>
    %71 = vector.broadcast %70 : vector<16x1xi1> to vector<16x128xi1>
    %72 = vector.broadcast %cst_27 : f32 to vector<16x128xf32>
    %73 = arith.select %71, %72, %69 : vector<16x128xi1>, vector<16x128xf32>
    %c16_i32_28 = arith.constant 16 : i32
    %74 = tpu.dynamic_rotate %57 by %c16_i32_28 dim 1 : vector<16x128xf32>, i32 -> vector<16x128xf32>
    %75 = arith.addf %68, %74 : vector<16x128xf32>
    %c32_i32 = arith.constant 32 : i32
    %76 = tpu.dynamic_rotate %73 by %c32_i32 dim 1 : vector<16x128xf32>, i32 -> vector<16x128xf32>
    %77 = arith.addf %75, %76 : vector<16x128xf32>
    %78 = arith.truncf %77 : vector<16x128xf32> to vector<16x128xbf16>
    %c0_29 = arith.constant 0 : index
    %c0_30 = arith.constant 0 : index
    %79 = vector.load %arg6[%c0_29, %c0_30] : memref<128x128xbf16, #tpu.memory_space<vmem>>, vector<128x128xbf16>
    %cst_31 = arith.constant dense<0.000000e+00> : vector<16x128xf32>
    %80 = tpu.matmul %78, %79, %cst_31 {dimension_numbers = #tpu.dot_dimension_numbers<[1], [0], [0], [1], [0, 0, 1, 1], [], []>} : vector<16x128xbf16>, vector<128x128xbf16>, vector<16x128xf32> -> vector<16x128xf32>
    %c0_32 = arith.constant 0 : index
    %c0_33 = arith.constant 0 : index
    %81 = vector.load %arg7[%c0_32, %c0_33] : memref<1x128xf32, #tpu.memory_space<vmem>>, vector<1x128xf32>
    %82 = vector.broadcast %81 : vector<1x128xf32> to vector<16x128xf32>
    %83 = arith.addf %80, %82 : vector<16x128xf32>
    %84 = vector.shape_cast %83 : vector<16x128xf32> to vector<1x16x128xf32>
    %cst_34 = arith.constant dense<0.000000e+00> : vector<1x128xf32>
    %85 = vector.multi_reduction <add>, %84, %cst_34 [1] : vector<1x16x128xf32> to vector<1x128xf32>
    %86 = vector.shape_cast %85 : vector<1x128xf32> to vector<1x1x128xf32>
    %cst_35 = arith.constant 1.600000e+01 : f32
    %87 = vector.broadcast %cst_35 : f32 to vector<1x1x128xf32>
    %88 = arith.divf %86, %87 : vector<1x1x128xf32>
    %89 = arith.mulf %84, %84 : vector<1x16x128xf32>
    %cst_36 = arith.constant dense<0.000000e+00> : vector<1x128xf32>
    %90 = vector.multi_reduction <add>, %89, %cst_36 [1] : vector<1x16x128xf32> to vector<1x128xf32>
    %91 = vector.shape_cast %90 : vector<1x128xf32> to vector<1x1x128xf32>
    %cst_37 = arith.constant 1.600000e+01 : f32
    %92 = vector.broadcast %cst_37 : f32 to vector<1x1x128xf32>
    %93 = arith.divf %91, %92 : vector<1x1x128xf32>
    %94 = arith.mulf %88, %88 : vector<1x1x128xf32>
    %95 = arith.subf %93, %94 : vector<1x1x128xf32>
    %cst_38 = arith.constant 0.000000e+00 : f32
    %96 = vector.broadcast %cst_38 : f32 to vector<1x1x128xf32>
    %97 = arith.maximumf %95, %96 : vector<1x1x128xf32>
    %98 = vector.broadcast %88 : vector<1x1x128xf32> to vector<1x16x128xf32>
    %99 = arith.subf %84, %98 : vector<1x16x128xf32>
    %cst_39 = arith.constant 9.99999974E-6 : f32
    %100 = vector.broadcast %cst_39 : f32 to vector<1x1x128xf32>
    %101 = arith.addf %97, %100 : vector<1x1x128xf32>
    %102 = math.rsqrt %101 : vector<1x1x128xf32>
    %103 = vector.broadcast %102 : vector<1x1x128xf32> to vector<1x16x128xf32>
    %104 = arith.mulf %99, %103 : vector<1x16x128xf32>
    %105 = vector.shape_cast %104 : vector<1x16x128xf32> to vector<16x128xf32>
    %cst_40 = arith.constant 5.000000e-01 : f32
    %106 = vector.broadcast %cst_40 : f32 to vector<16x128xf32>
    %107 = arith.mulf %106, %105 : vector<16x128xf32>
    %108 = math.tanh %107 : vector<16x128xf32>
    %cst_41 = arith.constant 5.000000e-01 : f32
    %109 = vector.broadcast %cst_41 : f32 to vector<16x128xf32>
    %110 = arith.mulf %109, %108 : vector<16x128xf32>
    %cst_42 = arith.constant 5.000000e-01 : f32
    %111 = vector.broadcast %cst_42 : f32 to vector<16x128xf32>
    %112 = arith.addf %110, %111 : vector<16x128xf32>
    %113 = arith.mulf %105, %112 : vector<16x128xf32>
    %c1_i32_43 = arith.constant 1 : i32
    %114 = tpu.dynamic_rotate %113 by %c1_i32_43 dim 0 : vector<16x128xf32>, i32 -> vector<16x128xf32>
    %cst_44 = arith.constant 0.000000e+00 : f32
    %115 = vector.shape_cast %25 : vector<16x1xi1> to vector<16x1xi1>
    %116 = vector.broadcast %115 : vector<16x1xi1> to vector<16x128xi1>
    %117 = vector.broadcast %cst_44 : f32 to vector<16x128xf32>
    %118 = arith.select %116, %117, %114 : vector<16x128xi1>, vector<16x128xf32>
    %c15_i32_45 = arith.constant 15 : i32
    %119 = tpu.dynamic_rotate %113 by %c15_i32_45 dim 0 : vector<16x128xf32>, i32 -> vector<16x128xf32>
    %cst_46 = arith.constant 0.000000e+00 : f32
    %120 = vector.shape_cast %27 : vector<16x1xi1> to vector<16x1xi1>
    %121 = vector.broadcast %120 : vector<16x1xi1> to vector<16x128xi1>
    %122 = vector.broadcast %cst_46 : f32 to vector<16x128xf32>
    %123 = arith.select %121, %122, %119 : vector<16x128xi1>, vector<16x128xf32>
    %c16_i32_47 = arith.constant 16 : i32
    %124 = tpu.dynamic_rotate %113 by %c16_i32_47 dim 1 : vector<16x128xf32>, i32 -> vector<16x128xf32>
    %125 = arith.addf %118, %124 : vector<16x128xf32>
    %c32_i32_48 = arith.constant 32 : i32
    %126 = tpu.dynamic_rotate %123 by %c32_i32_48 dim 1 : vector<16x128xf32>, i32 -> vector<16x128xf32>
    %127 = arith.addf %125, %126 : vector<16x128xf32>
    %128 = arith.truncf %127 : vector<16x128xf32> to vector<16x128xbf16>
    %c0_49 = arith.constant 0 : index
    %c0_50 = arith.constant 0 : index
    %129 = vector.load %arg8[%c0_49, %c0_50] : memref<128x16xbf16, #tpu.memory_space<vmem>>, vector<128x16xbf16>
    %cst_51 = arith.constant dense<0.000000e+00> : vector<16x16xf32>
    %130 = tpu.matmul %128, %129, %cst_51 {dimension_numbers = #tpu.dot_dimension_numbers<[1], [0], [0], [1], [0, 0, 1, 1], [], []>} : vector<16x128xbf16>, vector<128x16xbf16>, vector<16x16xf32> -> vector<16x16xf32>
    %c0_52 = arith.constant 0 : index
    %c0_53 = arith.constant 0 : index
    %131 = vector.load %arg9[%c0_52, %c0_53] : memref<1x16xf32, #tpu.memory_space<vmem>>, vector<1x16xf32>
    %132 = vector.broadcast %131 : vector<1x16xf32> to vector<16x16xf32>
    %133 = arith.addf %130, %132 : vector<16x16xf32>
    %134 = arith.addf %63, %133 : vector<16x16xf32>
    %135 = vector.shape_cast %134 : vector<16x16xf32> to vector<1x16x16xf32>
    %c0_54 = arith.constant 0 : index
    %c0_55 = arith.constant 0 : index
    %c0_56 = arith.constant 0 : index
    %136 = vector.load %arg10[%c0_54, %c0_55, %c0_56] : memref<1x16x16xf32, #tpu.memory_space<vmem>>, vector<1x16x16xf32>
    tpu.vector_store %arg10[%c0_54, %c0_55, %c0_56], %135 {strides = array<i32>} : memref<1x16x16xf32, #tpu.memory_space<vmem>>, vector<1x16x16xf32>,
    return
  }
  func.func @transform_0(%arg0: i32) -> (i32, i32, i32) {
    %c0_i32 = arith.constant 0 : i32
    %c0_i32_0 = arith.constant 0 : i32
    %c0_i32_1 = arith.constant 0 : i32
    return %arg0, %c0_i32, %c0_i32_0 : i32, i32, i32
  }
  func.func @transform_1(%arg0: i32) -> (i32, i32) {
    %c0_i32 = arith.constant 0 : i32
    %c0_i32_0 = arith.constant 0 : i32
    %c0_i32_1 = arith.constant 0 : i32
    return %c0_i32, %c0_i32_0 : i32, i32
  }
  func.func @transform_2(%arg0: i32) -> (i32, i32) {
    %c0_i32 = arith.constant 0 : i32
    %c0_i32_0 = arith.constant 0 : i32
    %c0_i32_1 = arith.constant 0 : i32
    return %c0_i32, %c0_i32_0 : i32, i32
  }
  func.func @transform_3(%arg0: i32) -> (i32, i32) {
    %c0_i32 = arith.constant 0 : i32
    %c0_i32_0 = arith.constant 0 : i32
    %c0_i32_1 = arith.constant 0 : i32
    return %c0_i32, %c0_i32_0 : i32, i32
  }
  func.func @transform_4(%arg0: i32) -> (i32, i32) {
    %c0_i32 = arith.constant 0 : i32
    %c0_i32_0 = arith.constant 0 : i32
    %c0_i32_1 = arith.constant 0 : i32
    return %c0_i32, %c0_i32_0 : i32, i32
  }
  func.func @transform_5(%arg0: i32) -> (i32, i32) {
    %c0_i32 = arith.constant 0 : i32
    %c0_i32_0 = arith.constant 0 : i32
    %c0_i32_1 = arith.constant 0 : i32
    return %c0_i32, %c0_i32_0 : i32, i32
  }
  func.func @transform_6(%arg0: i32) -> (i32, i32) {
    %c0_i32 = arith.constant 0 : i32
    %c0_i32_0 = arith.constant 0 : i32
    %c0_i32_1 = arith.constant 0 : i32
    return %c0_i32, %c0_i32_0 : i32, i32
  }
  func.func @transform_7(%arg0: i32) -> (i32, i32) {
    %c0_i32 = arith.constant 0 : i32
    %c0_i32_0 = arith.constant 0 : i32
    %c0_i32_1 = arith.constant 0 : i32
    return %c0_i32, %c0_i32_0 : i32, i32
  }
  func.func @transform_8(%arg0: i32) -> (i32, i32) {
    %c0_i32 = arith.constant 0 : i32
    %c0_i32_0 = arith.constant 0 : i32
    %c0_i32_1 = arith.constant 0 : i32
    return %c0_i32, %c0_i32_0 : i32, i32
  }
  func.func @transform_9(%arg0: i32) -> (i32, i32, i32) {
    %c0_i32 = arith.constant 0 : i32
    %c0_i32_0 = arith.constant 0 : i32
    %c0_i32_1 = arith.constant 0 : i32
    return %arg0, %c0_i32, %c0_i32_0 : i32, i32, i32
  }
}

</mosaic_0001>

<bundles_post_ra>
// kernel: _lambda_.1
= control target key start
LH: loop header
LB: loop body
LE: loop exit
PB: predicated region body
PF: predicated region fallthrough
CT: control target
= control target key end

     0   :  { %14 = vsyncpa [#allocation3], 0  ;;  %s1196_s30 = smov 0   ;;  %s1344_s0 = inlined_call_operand.vmem [shape: bf16[2,16,32], index: 0, kind: input, shape index: {}]   ;;  %s1345_s1 = inlined_call_operand.vmem [shape: bf16[32,128], index: 1, kind: input, shape index: {}]   ;;  %s1346_s2 = inlined_call_operand.vmem [shape: f32[1,128], index: 2, kind: input, shape index: {}]   ;;  %s1347_s3 = inlined_call_operand.hbm [shape: bf16[128,16], index: 3, kind: input, shape index: {}]   ;;  %s1348_s4 = inlined_call_operand.vmem [shape: f32[1,16], index: 4, kind: input, shape index: {}]   ;;  %s1349_s5 = inlined_call_operand.vmem [shape: bf16[128,128], index: 5, kind: input, shape index: {}]   ;;  %s1350_s6 = inlined_call_operand.vmem [shape: f32[1,128], index: 6, kind: input, shape index: {}]   ;;  %s1351_s7 = inlined_call_operand.vmem [shape: bf16[128,16], index: 7, kind: input, shape index: {}]   ;;  %s1352_s8 = inlined_call_operand.vmem [shape: f32[1,16], index: 8, kind: input, shape index: {}]   ;;  %s1353_s9 = inlined_call_operand.vmem [shape: f32[2,16,16], index: 9, kind: output, shape index: {}]  }
   0x1 LB: > { %s262_s12 = sshll.u32 %s1347_s3, 4  ;;  %s905_s13 = sadd.s32 4294967295, %s1138_s30   ;;  %s1138_s30 = sphi %s1196_s30, %s20_s30   ;;  %s263_s12 = int_to_ptr.hbm [resolvable:$true] %s262_s12 }
   0x2   : > { %p907_p0 = scmp.ge.s32.totalorder %s1138_s30, 1  ;;  %p245_p1 = scmp.lt.s32.totalorder %s1138_s30, 3 }
   0x3   : > { %p1064_p2 = scmp.eq.s32.totalorder %s905_s13, 0  ;;  %s1140_s14 = smov [#allocation2]  }
   0x4   : > { %p246_p3 = pnand %p907_p0, %p245_p1  ;;  %s264_s15 = sshll.u32 %s1140_s14, 4  ;;  %s265_s15 = int_to_ptr.vmem [resolvable:$true] %s264_s15 }
   0x5   : > { %s1141_s16 = smov 64   ;;  %s1142_s17 = smov 4  }
   0x6   : > { %p1060_p4 = pneg %p246_p3  ;;  %303 = sbr.rel (%p246_p3) target bundleno = 816 (0x330), region = 56 }
   0x8   : > { %p1061_p5 = pnand %p1064_p2, %p1060_p4 }
   0xa   : > { %1063 = dma.hbm_to_vmem [thread:$0]  (!%p1061_p5), %s263_s12, 1024, %s265_s15, [#allocation3], %s1141_s16, %s1141_s16, %s1142_s17  }
   0xb   : > { %1133 = dma.done.wait (%p1064_p2), [#allocation3], 1024  }
   0xc   : > { %1135 = vsyncadd (%p1064_p2), [#allocation3], 4294966272  ;;  %p340_p6 = scmp.lt.s32.totalorder %s905_s13, 1  ;;  %v1031_v0 = vld [vmem:[%s1345_s1 + $0x8] sm:$0xff]  ;;  %v1030_v1 = vld [vmem:[%s1345_s1] sm:$0xff]  ;;  %vm378_vm0 = vcmask 261120   ;;  %v396_v62 = vlaneseq }
   0xd   : > { %388 = vmatpush.bf16.msra.mxu0 %v1031_v0  ;;  %v1143_v3 = vmov 16.0   ;;  %v1080_v6 = vld [vmem:[%s1346_s2] ss:$0 sm:$0xff]  ;;  %v1039_v10 = vld [vmem:[#allocation2 + $0x38] sm:$0xff]  ;;  %v1038_v16 = vld [vmem:[#allocation2 + $0x30] sm:$0xff]  ;;  %s1144_s17 = smov 16  }
   0xe   : > { %s1359_s13 = smov (!%p340_p6, %s905_s13), 1  ;;  %1084 = vrcp.f32 %v1143_v3  ;;  %549 = vmatpush.bf16.msra.mxu1 %v1039_v10  ;;  %v1037_v22 = vld [vmem:[#allocation2 + $0x28] sm:$0xff]  ;;  %v1036_v28 = vld [vmem:[#allocation2 + $0x20] sm:$0xff]  ;;  %v1035_v34 = vld [vmem:[#allocation2 + $0x18] sm:$0xff]  ;;  %v1244_v3 = vshrl.u32 %v396_v62, 7  ;;  %vm835_vm12 = vcmask 130048  }
   0xf   : > { %s1027_s18 = sshll.u32 %s1359_s13, 3  ;;  %v1034_v39 = vld [vmem:[#allocation2 + $0x10] sm:$0xff]  ;;  %v1033_v42 = vld [vmem:[#allocation2 + $0x8] sm:$0xff]  ;;  %v1032_v44 = vld [vmem:[#allocation2] sm:$0xff]  ;;  %s1028_s10 = sshll.u32 %s1359_s13, 4 }
  0x10   : > { %s344_s25 = scalar_lea.vmem %s1344_s0, %s1027_s18  ;;  %v1047_v51 = vld [vmem:[%s1349_s5 + $0x38] sm:$0xff]  ;;  %v1046_v55 = vld [vmem:[%s1349_s5 + $0x30] sm:$0xff]  ;;  %v1045_v60 = vld [vmem:[%s1349_s5 + $0x28] sm:$0xff]  ;;  %vm576_vm5 = vcmp.lt.s32.totalorder %v1244_v3, 7  ;;  %vm565_vm6 = vcmp.lt.s32.totalorder %v1244_v3, 1  ;;  %s1145_s18 = smov 32  }
  0x11   : > { %v1029_v2 = vld [vmem:[%s344_s25] sm:$0xff]  ;;  %389 = vmatpush.bf16.msra.mxu0 %v1030_v1  ;;  %666 = vmatpush.bf16.msra.mxu2 %v1047_v51  ;;  %s349_s14 = scalar_lea.vmem %s1353_s9, %s1028_s10 }
  0x12   : > { %550 = vmatpush.bf16.msra.mxu1 %v1038_v16  ;;  %v1044_v61 = vld [vmem:[%s1349_s5 + $0x20] sm:$0xff] }
  0x14   : > { %928 = vmatmul.msk.bf16.vlgmr.msra.gmra.mxu0 %vm378_vm0, %v1029_v2  ;;  %v1085_v5 = vpop.eup %1084 }
  0x15   : > { %v435_v7 = vmul.f32 16.0, %v1085_v5  ;;  %vm439_vm1 = vweird.f32 %v1085_v5  ;;  %667 = vmatpush.bf16.msra.mxu2 %v1046_v55 }
  0x16   : > { %551 = vmatpush.bf16.msra.mxu1 %v1037_v22  ;;  %v1042_v22 = vld [vmem:[%s1349_s5 + $0x10] sm:$0xff] }
  0x17   : > { %v436_v12 = vsub.f32 1.0, %v435_v7 }
  0x19   : > { %v437_v19 = vmul.f32 %v1085_v5, %v436_v12  ;;  %668 = vmatpush.bf16.msra.mxu2 %v1045_v60 }
  0x1a   : > { %552 = vmatpush.bf16.msra.mxu1 %v1036_v28 }
  0x1b   : > { %v438_v25 = vadd.f32 %v1085_v5, %v437_v19 }
  0x1d   : > { %v1227_v31 = vsel %vm439_vm1, %v1085_v5, %v438_v25  ;;  %669 = vmatpush.bf16.msra.mxu2 %v1044_v61 }
  0x1e   : > { %553 = vmatpush.bf16.msra.mxu1 %v1035_v34 }
  0x22   : > { %554 = vmatpush.bf16.msra.mxu1 %v1034_v39  ;;  %v1082_v39 = vld [vmem:[%s1350_s6] ss:$0 sm:$0xff] }
  0x26   : > { %555 = vmatpush.bf16.msra.mxu1 %v1033_v42 }
  0x2a   : > { %556 = vmatpush.bf16.msra.mxu1 %v1032_v44 }
  0x91   : > { %v391_v4 = vpop.f32.mrf.mxu0 }
  0x92   : > { %v1222_v8 = vadd.f32 %v1080_v6, %v391_v4 }
  0x94   : > { %v442_v13 = vmul.f32 %v1222_v8, %v1222_v8 }
  0x99   : > { %v393_v9 = vpop.f32.mrf.mxu0 }
  0x9a   : > { %v394_v11 = vadd.f32 %v1080_v6, %v393_v9 }
  0x9c   : > { %v427_v14 = vadd.f32 %v394_v11, %v1222_v8  ;;  %v443_v15 = vmul.f32 %v394_v11, %v394_v11 }
  0x9e   : > { %v428_v17 = vrot.slane %v427_v14, 4  ;;  %v444_v18 = vadd.f32 %v443_v15, %v442_v13 }
  0xa0   : > { %v429_v20 = vadd.f32 %v428_v17, %v427_v14  ;;  %v445_v21 = vrot.slane %v444_v18, 4 }
  0xa2   : > { %v430_v23 = vrot.slane %v429_v20, 2  ;;  %v446_v24 = vadd.f32 %v445_v21, %v444_v18  ;;  %v1043_v21 = vld [vmem:[%s1349_s5 + $0x18] sm:$0xff]  ;;  %v1052_v18 = vld [vmem:[%s1351_s7 + $0x20] sm:$0xff] }
  0xa3   : > { %670 = vmatpush.bf16.msra.mxu2 %v1043_v21 }
  0xa4   : > { %v431_v26 = vadd.f32 %v430_v23, %v429_v20  ;;  %v447_v27 = vrot.slane %v446_v24, 2  ;;  %v1041_v23 = vld [vmem:[%s1349_s5 + $0x8] sm:$0xff] }
  0xa6   : > { %v432_v29 = vrot.slane %v431_v26, 1  ;;  %v448_v30 = vadd.f32 %v447_v27, %v446_v24  ;;  %v1040_v24 = vld [vmem:[%s1349_s5] sm:$0xff] }
  0xa7   : > { %671 = vmatpush.bf16.msra.mxu2 %v1042_v22 }
  0xa8   : > { %v433_v32 = vadd.f32 %v432_v29, %v431_v26  ;;  %v449_v33 = vrot.slane %v448_v30, 1  ;;  %v403_v26 = vand.u32 15, %v1244_v3 }
  0xaa   : > { %v441_v35 = vmul.f32 %v1227_v31, %v433_v32  ;;  %v450_v36 = vadd.f32 %v449_v33, %v448_v30  ;;  %vm1280_vm8 = vcmp.eq.s32.totalorder %v403_v26, 0 }
  0xab   : > { %672 = vmatpush.bf16.msra.mxu2 %v1041_v23 }
  0xac   : > { %v451_v37 = vmul.f32 %v450_v36, %v1227_v31  ;;  %v452_v38 = vmul.f32 %v441_v35, %v441_v35  ;;  %v455_v52 = vsub.f32 %v1222_v8, %v441_v35  ;;  %v456_v53 = vsub.f32 %v394_v11, %v441_v35 }
  0xad   : > { %v398_v8 = vadd.s32 8, %v1244_v3  ;;  %v1053_v3 = vld [vmem:[%s1351_s7 + $0x28] sm:$0xff] }
  0xae   : > { %v453_v40 = vsub.f32 %v451_v37, %v452_v38 }
  0xaf   : > { %v410_v17 = vand.u32 15, %v398_v8  ;;  %673 = vmatpush.bf16.msra.mxu2 %v1040_v24 }
  0xb0   : > { %v454_v41 = vmax.f32 %v453_v40, 0.0 }
  0xb1   : > { %vm1258_vm7 = vcmp.eq.s32.totalorder %v410_v17, 15 }
  0xb2   : > { %v457_v43 = vadd.f32 1e-05, %v454_v41 }
  0xb4   : > { %1086 = vrsqrt.f32 %v457_v43  ;;  %vm464_vm3 = vweird.f32 %v457_v43 }
  0xba   : > { %v1087_v45 = vpop.eup %1086 }
  0xbb   : > { %v459_v46 = vmul.f32 %v1087_v45, %v457_v43  ;;  %vm465_vm2 = vweird.f32 %v1087_v45 }
  0xbc   : > { %vm466_vm4 = vmor %vm464_vm3, %vm465_vm2 }
  0xbd   : > { %v460_v47 = vmul.f32 %v1087_v45, %v459_v46 }
  0xbf   : > { %v461_v48 = vmul.f32 0.5, %v460_v47 }
  0xc1   : > { %v462_v49 = vsub.f32 1.5, %v461_v48 }
  0xc3   : > { %v463_v50 = vmul.f32 %v1087_v45, %v462_v49 }
  0xc5   : > { %v467_v54 = vsel %vm466_vm4, %v1087_v45, %v463_v50 }
  0xc6   : > { %v468_v56 = vmul.f32 %v467_v54, %v455_v52  ;;  %v469_v57 = vmul.f32 %v467_v54, %v456_v53 }
  0xc8   : > { %v470_v58 = vmul.f32 0.5, %v468_v56  ;;  %v471_v59 = vmul.f32 0.5, %v469_v57 }
  0xca   : > { %1088 = vtanh.f32 %v470_v58 }
  0xcb   : > { %1090 = vtanh.f32 %v471_v59 }
  0xd0   : > { %v1089_v63 = vpop.eup %1088 }
  0xd1   : > { %v1091_v0 = vpop.eup %1090  ;;  %v474_v1 = vmul.f32 0.5, %v1089_v63 }
  0xd2   : > { %v475_v2 = vmul.f32 0.5, %v1091_v0 }
  0xd3   : > { %v476_v4 = vadd.f32 0.5, %v474_v1 }
  0xd4   : > { %v477_v5 = vadd.f32 0.5, %v475_v2 }
  0xd5   : > { %v478_v6 = vmul.f32 %v476_v4, %v468_v56 }
  0xd6   : > { %v479_v7 = vmul.f32 %v477_v5, %v469_v57 }
  0xd7   : > { %585 = vrot.lane.b32.xlu0 %v478_v6, %s1144_s17  ;;  %v574_v9 = vrot.slane %v478_v6, 1  ;;  %v563_v10 = vrot.slane %v478_v6, 7 }
  0xd8   : > { %v480_v11 = vpack.c.bf16 %v479_v7, %v478_v6  ;;  %v575_v12 = vrot.slane %v479_v7, 1  ;;  %v564_v13 = vrot.slane %v479_v7, 7 }
  0xda   : > { %557 = vmatmul.bf16.vlgmr.msra.gmra.mxu1 %v480_v11  ;;  %v577_v14 = vsel %vm576_vm5, %v574_v9, %v575_v12  ;;  %v567_v15 = vsel %vm565_vm6, %v564_v13, %v563_v10  ;;  %v566_v16 = vsel %vm565_vm6, %v563_v10, %v564_v13  ;;  %v578_v19 = vsel %vm576_vm5, %v575_v12, %v574_v9 }
  0xdb   : > { %591 = vrot.lane.b32.xlu1 %v577_v14, %s1145_s18  ;;  %v584_v20 = vsel %vm1258_vm7, 0.0, %v578_v19  ;;  %v572_v29 = vsel %vm1280_vm8, 0.0, %v567_v15 }
  0xdf   : > { %587 = vrot.lane.b32.xlu0 %v479_v7, %s1144_s17 }
  0xe3   : > { %593 = vrot.lane.b32.xlu1 %v584_v20, %s1145_s18 }
 0x149   : > { %v586_v25 = vpop.permute.xlu0 %585 }
 0x14a   : > { %v589_v32 = vadd.f32 %v586_v25, %v572_v29 }
 0x14d   : > { %v592_v27 = vpop.permute.xlu1 %591 }
 0x14e   : > { %v595_v35 = vadd.f32 %v592_v27, %v589_v32 }
 0x151   : > { %v588_v30 = vpop.permute.xlu0 %587 }
 0x152   : > { %v590_v33 = vadd.f32 %v588_v30, %v566_v16 }
 0x155   : > { %v594_v34 = vpop.permute.xlu1 %593 }
 0x156   : > { %v596_v36 = vadd.f32 %v594_v34, %v590_v33  ;;  %v1055_v34 = vld [vmem:[%s1351_s7 + $0x38] sm:$0xff] }
 0x157   : > { %819 = vmatpush.bf16.msra.mxu3 %v1055_v34 }
 0x158   : > { %v597_v37 = vpack.c.bf16 %v596_v36, %v595_v35  ;;  %v1054_v35 = vld [vmem:[%s1351_s7 + $0x30] sm:$0xff]  ;;  %v1051_v36 = vld [vmem:[%s1351_s7 + $0x18] sm:$0xff] }
 0x15a   : > { %674 = vmatmul.bf16.vlgmr.msra.gmra.mxu2 %v597_v37  ;;  %v1050_v37 = vld [vmem:[%s1351_s7 + $0x10] sm:$0xff] }
 0x15b   : > { %820 = vmatpush.bf16.msra.mxu3 %v1054_v35 }
 0x15f   : > { %821 = vmatpush.bf16.msra.mxu3 %v1053_v3 }
 0x163   : > { %822 = vmatpush.bf16.msra.mxu3 %v1052_v18 }
 0x167   : > { %823 = vmatpush.bf16.msra.mxu3 %v1051_v36 }
 0x16b   : > { %824 = vmatpush.bf16.msra.mxu3 %v1050_v37 }
 0x1dd   : > { %v675_v38 = vpop.f32.mrf.mxu2 }
 0x1de   : > { %v676_v40 = vadd.f32 %v1082_v39, %v675_v38  ;;  %v1049_v38 = vld [vmem:[%s1351_s7 + $0x8] sm:$0xff] }
 0x1df   : > { %825 = vmatpush.bf16.msra.mxu3 %v1049_v38 }
 0x1e0   : > { %v688_v43 = vmul.f32 %v676_v40, %v676_v40 }
 0x1e5   : > { %v677_v41 = vpop.f32.mrf.mxu2 }
 0x1e6   : > { %v678_v42 = vadd.f32 %v1082_v39, %v677_v41  ;;  %v1048_v39 = vld [vmem:[%s1351_s7] sm:$0xff] }
 0x1e7   : > { %826 = vmatpush.bf16.msra.mxu3 %v1048_v39 }
 0x1e8   : > { %v680_v44 = vadd.f32 %v678_v42, %v676_v40  ;;  %v689_v45 = vmul.f32 %v678_v42, %v678_v42 }
 0x1ea   : > { %v681_v46 = vrot.slane %v680_v44, 4  ;;  %v690_v47 = vadd.f32 %v689_v45, %v688_v43 }
 0x1ec   : > { %v682_v48 = vadd.f32 %v681_v46, %v680_v44  ;;  %v691_v49 = vrot.slane %v690_v47, 4 }
 0x1ee   : > { %v683_v50 = vrot.slane %v682_v48, 2  ;;  %v692_v51 = vadd.f32 %v691_v49, %v690_v47 }
 0x1f0   : > { %v684_v52 = vadd.f32 %v683_v50, %v682_v48  ;;  %v693_v53 = vrot.slane %v692_v51, 2  ;;  %v558_v50 = vpop.f32.mrf.mxu1 }
 0x1f2   : > { %v685_v54 = vrot.slane %v684_v52, 1  ;;  %v694_v55 = vadd.f32 %v693_v53, %v692_v51  ;;  %v1081_v51 = vld [vmem:[%s1348_s4] ss:$0 sm:$0xff] }
 0x1f3   : > { %v559_v53 = vadd.f32 %v1081_v51, %v558_v50 }
 0x1f4   : > { %v686_v56 = vadd.f32 %v685_v54, %v684_v52  ;;  %v695_v57 = vrot.slane %v694_v55, 1  ;;  %v1083_v52 = vld [vmem:[%s1352_s8] ss:$0 sm:$0xff] }
 0x1f6   : > { %v687_v58 = vmul.f32 %v686_v56, %v1227_v31  ;;  %v696_v59 = vadd.f32 %v695_v57, %v694_v55 }
 0x1f8   : > { %v697_v60 = vmul.f32 %v696_v59, %v1227_v31  ;;  %v698_v61 = vmul.f32 %v687_v58, %v687_v58  ;;  %v702_v8 = vsub.f32 %v678_v42, %v687_v58  ;;  %v701_v9 = vsub.f32 %v676_v40, %v687_v58  ;;  %v560_v56 = vpop.f32.mrf.mxu1 }
 0x1f9   : > { %v561_v58 = vadd.f32 %v1081_v51, %v560_v56 }
 0x1fa   : > { %v699_v62 = vsub.f32 %v697_v60, %v698_v61 }
 0x1fc   : > { %v700_v63 = vmax.f32 %v699_v62, 0.0 }
 0x1fe   : > { %v703_v0 = vadd.f32 1e-05, %v700_v63 }
 0x200   : > { %1092 = vrsqrt.f32 %v703_v0  ;;  %vm710_vm10 = vweird.f32 %v703_v0 }
 0x206   : > { %v1093_v1 = vpop.eup %1092 }
 0x207   : > { %v705_v2 = vmul.f32 %v1093_v1, %v703_v0  ;;  %vm711_vm9 = vweird.f32 %v1093_v1 }
 0x208   : > { %vm712_vm11 = vmor %vm710_vm10, %vm711_vm9 }
 0x209   : > { %v706_v4 = vmul.f32 %v1093_v1, %v705_v2 }
 0x20b   : > { %v707_v5 = vmul.f32 0.5, %v706_v4 }
 0x20d   : > { %v708_v6 = vsub.f32 1.5, %v707_v5 }
 0x20f   : > { %v709_v7 = vmul.f32 %v1093_v1, %v708_v6 }
 0x211   : > { %v713_v10 = vsel %vm712_vm11, %v1093_v1, %v709_v7 }
 0x212   : > { %v715_v11 = vmul.f32 %v713_v10, %v702_v8  ;;  %v714_v12 = vmul.f32 %v713_v10, %v701_v9 }
 0x214   : > { %v717_v31 = vmul.f32 0.5, %v715_v11  ;;  %v716_v13 = vmul.f32 0.5, %v714_v12 }
 0x216   : > { %1094 = vtanh.f32 %v717_v31 }
 0x217   : > { %1096 = vtanh.f32 %v716_v13 }
 0x21c   : > { %v1095_v14 = vpop.eup %1094 }
 0x21d   : > { %v1097_v15 = vpop.eup %1096  ;;  %v721_v16 = vmul.f32 0.5, %v1095_v14 }
 0x21e   : > { %v720_v17 = vmul.f32 0.5, %v1097_v15 }
 0x21f   : > { %v723_v19 = vadd.f32 0.5, %v721_v16 }
 0x220   : > { %v722_v20 = vadd.f32 0.5, %v720_v17 }
 0x221   : > { %v725_v21 = vmul.f32 %v723_v19, %v715_v11 }
 0x222   : > { %v724_v22 = vmul.f32 %v722_v20, %v714_v12 }
 0x223   : > { %v733_v23 = vrot.slane %v725_v21, 1  ;;  %v727_v24 = vrot.slane %v725_v21, 7 }
 0x224   : > { %738 = vrot.lane.b32.xlu2 %v724_v22, %s1144_s17  ;;  %v732_v25 = vrot.slane %v724_v22, 1  ;;  %v726_v26 = vrot.slane %v724_v22, 7 }
 0x226   : > { %v734_v27 = vsel %vm576_vm5, %v732_v25, %v733_v23  ;;  %v735_v29 = vsel %vm576_vm5, %v733_v23, %v732_v25  ;;  %v729_v30 = vsel %vm565_vm6, %v727_v24, %v726_v26  ;;  %v728_v32 = vsel %vm565_vm6, %v726_v26, %v727_v24 }
 0x227   : > { %744 = vrot.lane.b32.xlu0 %v734_v27, %s1145_s18  ;;  %v737_v33 = vsel %vm1258_vm7, 0.0, %v735_v29  ;;  %v730_v42 = vsel %vm1280_vm8, 0.0, %v729_v30 }
 0x228   : > { %746 = vrot.lane.b32.xlu1 %v737_v33, %s1145_s18 }
 0x22c   : > { %740 = vrot.lane.b32.xlu2 %v725_v21, %s1144_s17 }
 0x27e   : > { %v739_v40 = vpop.permute.xlu2 %738 }
 0x27f   : > { %v742_v43 = vadd.f32 %v739_v40, %v730_v42 }
 0x286   : > { %v741_v41 = vpop.permute.xlu2 %740 }
 0x287   : > { %v743_v44 = vadd.f32 %v741_v41, %v728_v32 }
 0x299   : > { %v745_v45 = vpop.permute.xlu0 %744 }
 0x29a   : > { %v748_v46 = vadd.f32 %v745_v45, %v742_v43  ;;  %v747_v47 = vpop.permute.xlu1 %746 }
 0x29b   : > { %v749_v48 = vadd.f32 %v747_v47, %v743_v44 }
 0x29d   : > { %v750_v49 = vpack.c.bf16 %v749_v48, %v748_v46 }
 0x29f   : > { %827 = vmatmul.bf16.vlgmr.msra.gmra.mxu3 %v750_v49 }
 0x322   : > { %v828_v28 = vpop.f32.mrf.mxu3 }
 0x323   : > { %v829_v54 = vadd.f32 %v1083_v52, %v828_v28 }
 0x325   : > { %v833_v55 = vadd.f32 %v829_v54, %v559_v53 }
 0x327   : > { %836 = vst.msk [vmem:[%s349_s14] sm:$0xff] %vm835_vm12, %v833_v55 }
 0x32a   : > { %v830_v57 = vpop.f32.mrf.mxu3 }
 0x32b   : > { %v831_v59 = vadd.f32 %v1083_v52, %v830_v57 }
 0x32d   : > { %v834_v60 = vadd.f32 %v831_v59, %v561_v58 }
 0x32f   : > { %837 = vst.msk [vmem:[%s349_s14 + $0x8] sm:$0xff] %vm835_vm12, %v834_v60 }
 0x330 PF: > { %s20_s30 = sadd.s32 1, %s1138_s30  }
 0x331   : > { %p17_p7 = scmp.ge.s32.totalorder %s20_s30, 4  }
 0x333   :  { %19 = sbr.rel (!%p17_p7) target bundleno = 1 (0x1), region = 91 }
 0x338   :  { %859 = vsyncpa [#allocation3], 1 }
 0x339   :  { %861 = vsyncpa [#allocation3 + $0x1], 1 }

</bundles_post_ra>
